<compile_context>
chip_gen: v5e
topology: v5e:2x2
jax: 0.10.0
libtpu: 0.0.40
codegen_flags: <defaults>
</compile_context>

<pallas_src>
import jax
import jax.numpy as jnp
from jax.experimental import pallas as pl
from jax.experimental.pallas import tpu as pltpu


# Only bother splitting the copy into multiple in-flight DMAs once each chunk
# is at least this big; tiny tensors go as a single DMA.
_MIN_CHUNK_BYTES = 512 * 1024


def _make_dma_copy_kernel(n_chunks: int):
    """Build a kernel that copies x -> o with `n_chunks` concurrent HBM DMAs."""

    def kernel(x_hbm, o_hbm, sems):
        copies = []
        for c in range(n_chunks):  # static Python loop: chunk count is compile-time
            if n_chunks > 1:
                src, dst = x_hbm.at[c], o_hbm.at[c]
            else:
                src, dst = x_hbm, o_hbm
            cp = pltpu.make_async_copy(src, dst, sems.at[c])
            cp.start()
            copies.append(cp)
        for cp in copies:
            cp.wait()

    return kernel


def _pallas_identity_copy(x: jax.Array) -> jax.Array:
    """Bit-exact copy of `x` into a fresh buffer via direct HBM->HBM DMA."""
    total = x.size
    itemsize = jnp.dtype(x.dtype).itemsize
    nbytes = total * itemsize

    # Pick up to 8 concurrent DMA chunks for large tensors; 1 for small/odd ones.
    n_chunks = 1
    for c in (8, 4, 2):
        if total % c == 0 and nbytes // c >= _MIN_CHUNK_BYTES:
            n_chunks = c
            break

    # Leading-axis chunking via a free row-major reshape (metadata only).
    x_in = x.reshape(n_chunks, total // n_chunks) if n_chunks > 1 else x

    out = pl.pallas_call(
        _make_dma_copy_kernel(n_chunks),
        out_shape=jax.ShapeDtypeStruct(x_in.shape, x_in.dtype),
        in_specs=[pl.BlockSpec(memory_space=pl.ANY)],   # stay in HBM, no auto-DMA
        out_specs=pl.BlockSpec(memory_space=pl.ANY),    # write via explicit DMA
        scratch_shapes=[pltpu.SemaphoreType.DMA((n_chunks,))],
        cost_estimate=pl.CostEstimate(
            flops=0, transcendentals=0, bytes_accessed=2 * nbytes
        ),
    )(x_in)
    return out.reshape(x.shape)


def input_forward(x: jax.Array, copy: bool = False) -> jax.Array:
    """Pallas implementation of Input.forward(x) == x.

    The optimal identity is no work at all, so by default this simply returns
    `x` (zero HBM traffic).  Pass copy=True when the caller truly needs a
    distinct output buffer; that path is a shape-agnostic HBM->HBM DMA copy.
    """
    if not copy:
        return x
    return _pallas_identity_copy(x)


if __name__ == "__main__":
    key = jax.random.PRNGKey(0)
    x = jax.random.normal(key, (2, 4, 16, 16), dtype=jnp.float32)

    # Zero-cost identity path (default).
    y0 = input_forward(x)
    jax.block_until_ready(y0)
    assert y0.shape == x.shape and y0.dtype == x.dtype
    assert bool(jnp.array_equal(y0, x))

    # Explicit fresh-buffer path: exercises the Pallas HBM->HBM DMA kernel.
    y1 = input_forward(x, copy=True)
    jax.block_until_ready(y1)
    assert y1.shape == x.shape and y1.dtype == x.dtype
    assert bool(jnp.array_equal(y1, x))

    # Odd, non-128-divisible shape: proves the DMA path is shape-agnostic
    # (the old VMEM single-block fallback is gone).
    x2 = jax.random.normal(jax.random.PRNGKey(1), (3, 5, 7), dtype=jnp.bfloat16)
    y2 = input_forward(x2, copy=True)
    jax.block_until_ready(y2)
    assert y2.shape == x2.shape and y2.dtype == x2.dtype
    assert bool(jnp.array_equal(y2, x2))

    print("KERNEL_OK")
</pallas_src>

<mosaic_0001>
module attributes {stable_mosaic.version = 11 : i64} {
  func.func @kernel(%arg0: memref<2x4x16x16xf32, #tpu.memory_space<any>>, %arg1: memref<2x4x16x16xf32, #tpu.memory_space<any>>, %arg2: memref<1x!tpu.dma_semaphore, #tpu.memory_space<semaphore_mem>>) attributes {dimension_semantics = [], scalar_prefetch = 0 : i64, scratch_operands = 1 : i64, tpu.core_type = #tpu.core_type<tc>} {
    %c0_i32 = arith.constant 0 : i32
    %0 = tpu.memref_slice %arg2[%c0_i32] : memref<1x!tpu.dma_semaphore, #tpu.memory_space<semaphore_mem>> -> memref<1x!tpu.dma_semaphore, #tpu.memory_space<semaphore_mem>>
    %1 = tpu.memref_squeeze %0 : memref<1x!tpu.dma_semaphore, #tpu.memory_space<semaphore_mem>> -> memref<!tpu.dma_semaphore, #tpu.memory_space<semaphore_mem>>
    tpu.enqueue_dma source(%arg0 : memref<2x4x16x16xf32, #tpu.memory_space<any>>) target(%arg1 : memref<2x4x16x16xf32, #tpu.memory_space<any>>) target_semaphore(%1 : memref<!tpu.dma_semaphore, #tpu.memory_space<semaphore_mem>>)
    %c0_i32_0 = arith.constant 0 : i32
    %2 = tpu.memref_slice %arg2[%c0_i32_0] : memref<1x!tpu.dma_semaphore, #tpu.memory_space<semaphore_mem>> -> memref<1x!tpu.dma_semaphore, #tpu.memory_space<semaphore_mem>>
    %3 = tpu.memref_squeeze %2 : memref<1x!tpu.dma_semaphore, #tpu.memory_space<semaphore_mem>> -> memref<!tpu.dma_semaphore, #tpu.memory_space<semaphore_mem>>
    tpu.wait_dma2 semaphore(%3 : memref<!tpu.dma_semaphore, #tpu.memory_space<semaphore_mem>>) src(%arg0 : memref<2x4x16x16xf32, #tpu.memory_space<any>>) dst(%arg1 : memref<2x4x16x16xf32, #tpu.memory_space<any>>)
    return
  }
}

</mosaic_0001>

<bundles_post_ra>
// kernel: tpu_custom_call.1
= control target key start
LH: loop header
LB: loop body
LE: loop exit
PB: predicated region body
PF: predicated region fallthrough
CT: control target
= control target key end

     0   :  { %s34_s12 = smov [#allocation2]   ;;  %s35_s13 = smov [#allocation3]   ;;  %s53_s0 = inlined_call_operand.hbm [shape: f32[2,4,16,16], index: 0, kind: input, shape index: {}]   ;;  %s54_s1 = inlined_call_operand.hbm [shape: f32[2,4,16,16], index: 1, kind: output, shape index: {}]  }
   0x1   :  { %s10_s8 = sshll.u32 %s53_s0, 4  ;;  %s12_s11 = sshll.u32 %s54_s1, 4  ;;  %s11_s8 = int_to_ptr.hbm [resolvable:$true] %s10_s8  ;;  %s13_s11 = int_to_ptr.hbm [resolvable:$true] %s12_s11 }
   0x2   :  { %s36_s14 = smov 0  }
   0x3   :  { %16 = dma.general %s11_s8, 2048, %s13_s11, %s34_s12, %s35_s13, [#allocation4], %s36_s14, 0  }
   0x4   :  { %32 = dma.done.wait [#allocation2], 2048 }
   0x5   :  { %33 = vsyncadd [#allocation2], 4294965248 }
   0x6   :  { %22 = vsyncmov [#allocation2] }
   0x9   :  { %s23_s15 = vpop.sfrf %22 }
   0xa   :  { %p28_p0 = scmp.ne.s32.totalorder %s23_s15, 0 }
   0xc   :  { %27 = shalt.err (%p28_p0)  }

</bundles_post_ra>
